<compile_context>
chip_gen: v5e
topology: v5e:2x2
jax: 0.10.0
libtpu: 0.0.40
codegen_flags: <defaults>
</compile_context>

<pallas_src>
import jax
import jax.numpy as jnp
from jax import lax
from jax.experimental import pallas as pl
from jax.experimental.pallas import tpu as pltpu


def _softplus(x):
    # Matches torch.nn.Softplus(beta=1, threshold=20).
    return jnp.where(x > 20.0, x, jnp.log1p(jnp.exp(jnp.minimum(x, 20.0))))


def _round_up(a, m):
    return ((a + m - 1) // m) * m


def ann_kernel(x_ref, w0_ref, b0_ref, w1_ref, b1_ref, w2_ref, b2_ref, out_ref):
    """One batch tile of the 3-layer MLP.  Activations are kept in transposed
    (features on sublanes, batch on lanes) layout so the (2, bt) output slab
    is written with lane-dense stores."""
    x = x_ref[...]                                              # (bt, D_in) native layout

    # Layer 0: h0 = w0 @ x^T — contract x's last axis directly (no transpose pass).
    h = lax.dot_general(w0_ref[...], x, (((1,), (1,)), ((), ())),
                        preferred_element_type=jnp.float32) + b0_ref[...]
    h = jnp.maximum(h, 0.0)                                     # ReLU; Dropout = identity (eval)

    # Layer 1.
    h = jnp.dot(w1_ref[...], h, preferred_element_type=jnp.float32) + b1_ref[...]
    h = jnp.maximum(h, 0.0)

    # Output layer: (2, bt) — row 0 = mean, row 1 = pre-softplus variance.
    out = jnp.dot(w2_ref[...], h, preferred_element_type=jnp.float32) + b2_ref[...]

    # con_probmodel head: two sub-row stores (softplus only on the var row).
    out_ref[0:1, :] = out[0:1, :]
    out_ref[1:2, :] = _softplus(out[1:2, :])


def _choose_tile(B, max_bt):
    """Batch-tile (lane) size and grid length.

    - Single full-array block when the whole batch fits (no alignment needed).
    - Otherwise multiple-of-256 tiles with an even step count so v7x's two
      TensorCores split the "parallel" grid axis.
    """
    if B <= max_bt:
        return B, 1
    n = pl.cdiv(B, max_bt)
    if n % 2:
        n += 1
    bt = _round_up(pl.cdiv(B, n), 256)
    n = pl.cdiv(B, bt)
    return bt, n


def ann_forward(x, folded_params, *, max_batch_tile=16384):
    """Eval-mode forward.  x: (B, input_dim) f32.  Returns (mean, var), each (B, 1)."""
    w0, b0, w1, b1, w2, b2 = folded_params          # PyTorch (out, in) layout; biases (out, 1)
    B, D_in = x.shape
    H0 = w0.shape[0]
    H1 = w1.shape[0]
    D_out2 = w2.shape[0]                            # = 2*output_dim (con_probmodel)

    bt, n_steps = _choose_tile(B, max_batch_tile)

    param_elems = sum(int(p.size) for p in (w0, b0, w1, b1, w2, b2))
    cost = pl.CostEstimate(
        flops=2 * B * (D_in * H0 + H0 * H1 + H1 * D_out2),
        transcendentals=2 * B,
        bytes_accessed=4 * (B * D_in + B * D_out2 + param_elems),
    )

    grid_spec = pltpu.PrefetchScalarGridSpec(
        num_scalar_prefetch=0,
        grid=(n_steps,),
        in_specs=[
            pl.BlockSpec((bt, D_in), lambda i: (i, 0)),      # x tile, native layout
            pl.BlockSpec((H0, D_in), lambda i: (0, 0)),      # w0 (BN-folded), resident
            pl.BlockSpec((H0, 1), lambda i: (0, 0)),         # b0 (BN-folded)
            pl.BlockSpec((H1, H0), lambda i: (0, 0)),        # w1 (BN-folded)
            pl.BlockSpec((H1, 1), lambda i: (0, 0)),         # b1 (BN-folded)
            pl.BlockSpec((D_out2, H1), lambda i: (0, 0)),    # w2
            pl.BlockSpec((D_out2, 1), lambda i: (0, 0)),     # b2
        ],
        out_specs=pl.BlockSpec((D_out2, bt), lambda i: (0, i)),   # lane-dense (2, B) slab
    )

    out_t = pl.pallas_call(
        ann_kernel,
        out_shape=jax.ShapeDtypeStruct((D_out2, B), jnp.float32),
        grid_spec=grid_spec,
        compiler_params=pltpu.CompilerParams(
            dimension_semantics=("parallel",)),
        cost_estimate=cost,
    )(x, w0, b0, w1, b1, w2, b2)

    mean = out_t[0, :][:, None]
    var = out_t[1, :][:, None]
    return mean, var


# ----------------------------- parameter setup ------------------------------

def xavier_uniform(key, fan_out, fan_in):
    # nn.init.xavier_uniform_ (gain=1), PyTorch layout (out_features, in_features).
    a = (6.0 / (fan_in + fan_out)) ** 0.5
    return jax.random.uniform(key, (fan_out, fan_in), jnp.float32, -a, a)


def make_raw_params(key, input_dim, hidden_dims, output_dim, con_probmodel=True):
    """Raw (unfolded) params in PyTorch layout, plus eval-mode BatchNorm stats."""
    out_dim = 2 * output_dim if con_probmodel else output_dim
    h0, h1 = hidden_dims
    keys = jax.random.split(key, 11)

    # BN params/stats randomized (as after training) to exercise the BN folding.
    def bn(kg, kb, km, kv, h):
        return dict(
            gamma=1.0 + 0.1 * jax.random.normal(kg, (h,), jnp.float32),
            beta=0.1 * jax.random.normal(kb, (h,), jnp.float32),
            mean=0.1 * jax.random.normal(km, (h,), jnp.float32),
            var=jnp.abs(1.0 + 0.1 * jax.random.normal(kv, (h,), jnp.float32)),
        )

    return dict(
        w0=xavier_uniform(keys[0], h0, input_dim), b0=jnp.zeros((h0,), jnp.float32),
        bn0=bn(keys[1], keys[2], keys[3], keys[4], h0),
        w1=xavier_uniform(keys[5], h1, h0), b1=jnp.zeros((h1,), jnp.float32),
        bn1=bn(keys[6], keys[7], keys[8], keys[9], h1),
        w2=xavier_uniform(keys[10], out_dim, h1), b2=jnp.zeros((out_dim,), jnp.float32),
    )


def fold_bn(raw, eps=1e-5):
    """Fold eval-mode BatchNorm affine into the preceding Linear weights/biases."""
    def fold(w, b, bn):
        scale = bn["gamma"] / jnp.sqrt(bn["var"] + eps)
        shift = bn["beta"] - bn["mean"] * scale
        return w * scale[:, None], (b * scale + shift)[:, None]

    w0f, b0f = fold(raw["w0"], raw["b0"], raw["bn0"])
    w1f, b1f = fold(raw["w1"], raw["b1"], raw["bn1"])
    return (w0f, b0f, w1f, b1f, raw["w2"], raw["b2"][:, None])


def reference_forward(x, raw, eps=1e-5):
    """Pure-JAX reference of the eval-mode PyTorch forward (unfolded BN)."""
    def bn_apply(h, bn):
        return (h - bn["mean"]) / jnp.sqrt(bn["var"] + eps) * bn["gamma"] + bn["beta"]

    h = jnp.maximum(bn_apply(x @ raw["w0"].T + raw["b0"], raw["bn0"]), 0.0)
    h = jnp.maximum(bn_apply(h @ raw["w1"].T + raw["b1"], raw["bn1"]), 0.0)
    out = h @ raw["w2"].T + raw["b2"]
    return out[:, 0:1], _softplus(out[:, 1:2])


if __name__ == "__main__":
    key = jax.random.PRNGKey(0)
    kp, kx = jax.random.split(key)

    input_dim, hidden_dims, output_dim = 16, [32, 32], 1
    B = 1000  # small test batch; not a multiple of 128/256

    raw = make_raw_params(kp, input_dim, hidden_dims, output_dim, con_probmodel=True)
    folded = fold_bn(raw)
    x = jax.random.normal(kx, (B, input_dim), jnp.float32)

    ref_mean, ref_var = reference_forward(x, raw)

    # Path 1: single full-batch block (default tile selection).
    mean, var = ann_forward(x, folded)
    jax.block_until_ready((mean, var))
    assert mean.shape == (B, 1) and var.shape == (B, 1)
    assert jnp.allclose(mean, ref_mean, atol=1e-4, rtol=1e-4)
    assert jnp.allclose(var, ref_var, atol=1e-4, rtol=1e-4)
    assert bool(jnp.all(var > 0.0))

    # Path 2: multi-step grid with a ragged last tile (exercises the pipelined,
    # partial-block path used for large batches).
    mean2, var2 = ann_forward(x, folded, max_batch_tile=256)
    jax.block_until_ready((mean2, var2))
    assert jnp.allclose(mean2, ref_mean, atol=1e-4, rtol=1e-4)
    assert jnp.allclose(var2, ref_var, atol=1e-4, rtol=1e-4)

    print("KERNEL_OK")
</pallas_src>

<mosaic_0001>
module attributes {stable_mosaic.version = 11 : i64} {
  func.func @ann_kernel(%arg0: i32, %arg1: memref<1000x16xf32, #tpu.memory_space<vmem>>, %arg2: memref<32x16xf32, #tpu.memory_space<vmem>>, %arg3: memref<32x1xf32, #tpu.memory_space<vmem>>, %arg4: memref<32x32xf32, #tpu.memory_space<vmem>>, %arg5: memref<32x1xf32, #tpu.memory_space<vmem>>, %arg6: memref<2x32xf32, #tpu.memory_space<vmem>>, %arg7: memref<2x1xf32, #tpu.memory_space<vmem>>, %arg8: memref<2x1000xf32, #tpu.memory_space<vmem>>) attributes {dimension_semantics = [#tpu.dimension_semantics<parallel>], iteration_bounds = array<i64: 1>, scalar_prefetch = 0 : i64, scratch_operands = 0 : i64, tpu.core_type = #tpu.core_type<tc>, window_params = [{transform_indices = @transform_0, window_bounds = array<i64: 1000, 16>}, {pipeline_mode = #tpu.pipeline_mode<synchronous>, transform_indices = @transform_1, window_bounds = array<i64: 32, 16>}, {pipeline_mode = #tpu.pipeline_mode<synchronous>, transform_indices = @transform_2, window_bounds = array<i64: 32, 1>}, {pipeline_mode = #tpu.pipeline_mode<synchronous>, transform_indices = @transform_3, window_bounds = array<i64: 32, 32>}, {pipeline_mode = #tpu.pipeline_mode<synchronous>, transform_indices = @transform_4, window_bounds = array<i64: 32, 1>}, {pipeline_mode = #tpu.pipeline_mode<synchronous>, transform_indices = @transform_5, window_bounds = array<i64: 2, 32>}, {pipeline_mode = #tpu.pipeline_mode<synchronous>, transform_indices = @transform_6, window_bounds = array<i64: 2, 1>}, {transform_indices = @transform_7, window_bounds = array<i64: 2, 1000>}]} {
    %c0 = arith.constant 0 : index
    %c0_0 = arith.constant 0 : index
    %0 = vector.load %arg1[%c0, %c0_0] : memref<1000x16xf32, #tpu.memory_space<vmem>>, vector<1000x16xf32>
    %c0_1 = arith.constant 0 : index
    %c0_2 = arith.constant 0 : index
    %1 = vector.load %arg2[%c0_1, %c0_2] : memref<32x16xf32, #tpu.memory_space<vmem>>, vector<32x16xf32>
    %cst = arith.constant dense<0.000000e+00> : vector<32x1000xf32>
    %2 = tpu.matmul %1, %0, %cst {dimension_numbers = #tpu.dot_dimension_numbers<[1], [1], [0], [0], [0, 0, 1, 0], [], []>} : vector<32x16xf32>, vector<1000x16xf32>, vector<32x1000xf32> -> vector<32x1000xf32>
    %c0_3 = arith.constant 0 : index
    %c0_4 = arith.constant 0 : index
    %3 = vector.load %arg3[%c0_3, %c0_4] : memref<32x1xf32, #tpu.memory_space<vmem>>, vector<32x1xf32>
    %4 = vector.broadcast %3 : vector<32x1xf32> to vector<32x1000xf32>
    %5 = arith.addf %2, %4 : vector<32x1000xf32>
    %cst_5 = arith.constant 0.000000e+00 : f32
    %6 = vector.broadcast %cst_5 : f32 to vector<32x1000xf32>
    %7 = arith.maximumf %5, %6 : vector<32x1000xf32>
    %c0_6 = arith.constant 0 : index
    %c0_7 = arith.constant 0 : index
    %8 = vector.load %arg4[%c0_6, %c0_7] : memref<32x32xf32, #tpu.memory_space<vmem>>, vector<32x32xf32>
    %cst_8 = arith.constant dense<0.000000e+00> : vector<32x1000xf32>
    %9 = tpu.matmul %8, %7, %cst_8 {dimension_numbers = #tpu.dot_dimension_numbers<[1], [0], [0], [1], [0, 0, 1, 1], [], []>} : vector<32x32xf32>, vector<32x1000xf32>, vector<32x1000xf32> -> vector<32x1000xf32>
    %c0_9 = arith.constant 0 : index
    %c0_10 = arith.constant 0 : index
    %10 = vector.load %arg5[%c0_9, %c0_10] : memref<32x1xf32, #tpu.memory_space<vmem>>, vector<32x1xf32>
    %11 = vector.broadcast %10 : vector<32x1xf32> to vector<32x1000xf32>
    %12 = arith.addf %9, %11 : vector<32x1000xf32>
    %cst_11 = arith.constant 0.000000e+00 : f32
    %13 = vector.broadcast %cst_11 : f32 to vector<32x1000xf32>
    %14 = arith.maximumf %12, %13 : vector<32x1000xf32>
    %c0_12 = arith.constant 0 : index
    %c0_13 = arith.constant 0 : index
    %15 = vector.load %arg6[%c0_12, %c0_13] : memref<2x32xf32, #tpu.memory_space<vmem>>, vector<2x32xf32>
    %cst_14 = arith.constant dense<0.000000e+00> : vector<2x1000xf32>
    %16 = tpu.matmul %15, %14, %cst_14 {dimension_numbers = #tpu.dot_dimension_numbers<[1], [0], [0], [1], [0, 0, 1, 1], [], []>} : vector<2x32xf32>, vector<32x1000xf32>, vector<2x1000xf32> -> vector<2x1000xf32>
    %c0_15 = arith.constant 0 : index
    %c0_16 = arith.constant 0 : index
    %17 = vector.load %arg7[%c0_15, %c0_16] : memref<2x1xf32, #tpu.memory_space<vmem>>, vector<2x1xf32>
    %18 = vector.broadcast %17 : vector<2x1xf32> to vector<2x1000xf32>
    %19 = arith.addf %16, %18 : vector<2x1000xf32>
    %20 = vector.extract_strided_slice %19 {offsets = [0, 0], sizes = [1, 1000], strides = [1, 1]} : vector<2x1000xf32> to vector<1x1000xf32>
    %c0_17 = arith.constant 0 : index
    %c0_18 = arith.constant 0 : index
    %21 = vector.load %arg8[%c0_17, %c0_18] : memref<2x1000xf32, #tpu.memory_space<vmem>>, vector<1x1000xf32>
    tpu.vector_store %arg8[%c0_17, %c0_18], %20 {strides = array<i32>} : memref<2x1000xf32, #tpu.memory_space<vmem>>, vector<1x1000xf32>,
    %22 = vector.extract_strided_slice %19 {offsets = [1, 0], sizes = [1, 1000], strides = [1, 1]} : vector<2x1000xf32> to vector<1x1000xf32>
    %cst_19 = arith.constant 2.000000e+01 : f32
    %23 = vector.broadcast %cst_19 : f32 to vector<1x1000xf32>
    %24 = arith.cmpf ogt, %22, %23 : vector<1x1000xf32>
    %cst_20 = arith.constant 2.000000e+01 : f32
    %25 = vector.broadcast %cst_20 : f32 to vector<1x1000xf32>
    %26 = arith.minimumf %22, %25 : vector<1x1000xf32>
    %27 = math.exp %26 : vector<1x1000xf32>
    %28 = math.log1p %27 : vector<1x1000xf32>
    %29 = arith.select %24, %22, %28 : vector<1x1000xi1>, vector<1x1000xf32>
    %c1 = arith.constant 1 : index
    %c0_21 = arith.constant 0 : index
    %30 = vector.load %arg8[%c1, %c0_21] : memref<2x1000xf32, #tpu.memory_space<vmem>>, vector<1x1000xf32>
    tpu.vector_store %arg8[%c1, %c0_21], %29 {strides = array<i32>} : memref<2x1000xf32, #tpu.memory_space<vmem>>, vector<1x1000xf32>,
    return
  }
  func.func @transform_0(%arg0: i32) -> (i32, i32) {
    %c0_i32 = arith.constant 0 : i32
    %c0_i32_0 = arith.constant 0 : i32
    return %arg0, %c0_i32 : i32, i32
  }
  func.func @transform_1(%arg0: i32) -> (i32, i32) {
    %c0_i32 = arith.constant 0 : i32
    %c0_i32_0 = arith.constant 0 : i32
    %c0_i32_1 = arith.constant 0 : i32
    return %c0_i32, %c0_i32_0 : i32, i32
  }
  func.func @transform_2(%arg0: i32) -> (i32, i32) {
    %c0_i32 = arith.constant 0 : i32
    %c0_i32_0 = arith.constant 0 : i32
    %c0_i32_1 = arith.constant 0 : i32
    return %c0_i32, %c0_i32_0 : i32, i32
  }
  func.func @transform_3(%arg0: i32) -> (i32, i32) {
    %c0_i32 = arith.constant 0 : i32
    %c0_i32_0 = arith.constant 0 : i32
    %c0_i32_1 = arith.constant 0 : i32
    return %c0_i32, %c0_i32_0 : i32, i32
  }
  func.func @transform_4(%arg0: i32) -> (i32, i32) {
    %c0_i32 = arith.constant 0 : i32
    %c0_i32_0 = arith.constant 0 : i32
    %c0_i32_1 = arith.constant 0 : i32
    return %c0_i32, %c0_i32_0 : i32, i32
  }
  func.func @transform_5(%arg0: i32) -> (i32, i32) {
    %c0_i32 = arith.constant 0 : i32
    %c0_i32_0 = arith.constant 0 : i32
    %c0_i32_1 = arith.constant 0 : i32
    return %c0_i32, %c0_i32_0 : i32, i32
  }
  func.func @transform_6(%arg0: i32) -> (i32, i32) {
    %c0_i32 = arith.constant 0 : i32
    %c0_i32_0 = arith.constant 0 : i32
    %c0_i32_1 = arith.constant 0 : i32
    return %c0_i32, %c0_i32_0 : i32, i32
  }
  func.func @transform_7(%arg0: i32) -> (i32, i32) {
    %c0_i32 = arith.constant 0 : i32
    %c0_i32_0 = arith.constant 0 : i32
    return %c0_i32, %arg0 : i32, i32
  }
}

</mosaic_0001>

<bundles_post_ra>
// kernel: tpu_custom_call.1
= control target key start
LH: loop header
LB: loop body
LE: loop exit
PB: predicated region body
PF: predicated region fallthrough
CT: control target
= control target key end

     0   :  { %vm180_vm0 = vcmask 130048   ;;  %s2651_s0 = inlined_call_operand.vmem [shape: f32[1000,16], index: 0, kind: input, shape index: {}]   ;;  %s2652_s1 = inlined_call_operand.vmem [shape: f32[32,16], index: 1, kind: input, shape index: {}]   ;;  %s2653_s2 = inlined_call_operand.vmem [shape: f32[32,1], index: 2, kind: input, shape index: {}]   ;;  %s2654_s3 = inlined_call_operand.vmem [shape: f32[32,32], index: 3, kind: input, shape index: {}]   ;;  %s2655_s4 = inlined_call_operand.vmem [shape: f32[32,1], index: 4, kind: input, shape index: {}]   ;;  %s2656_s5 = inlined_call_operand.vmem [shape: f32[2,32], index: 5, kind: input, shape index: {}]   ;;  %s2657_s6 = inlined_call_operand.vmem [shape: f32[2,1], index: 6, kind: input, shape index: {}]   ;;  %s2658_s7 = inlined_call_operand.hbm [shape: f32[2,1000], index: 7, kind: output, shape index: {}]  }
   0x1   :  { %v42_v0 = vld [vmem:[%s2651_s0 + $0x78] sm:$0xff]  ;;  %v41_v4 = vld [vmem:[%s2651_s0 + $0x70] sm:$0xff]  ;;  %v40_v8 = vld [vmem:[%s2651_s0 + $0x68] sm:$0xff] }
   0x2   :  { %v58_v1 = vld [vmem:[%s2651_s0 + $0xf8] sm:$0xff]  ;;  %1491 = vmatpush.xpose.msk.msra.mxu0 %vm180_vm0, %v42_v0  ;;  %v57_v5 = vld [vmem:[%s2651_s0 + $0xf0] sm:$0xff]  ;;  %v56_v9 = vld [vmem:[%s2651_s0 + $0xe8] sm:$0xff] }
   0x3   :  { %v74_v2 = vld [vmem:[%s2651_s0 + $0x178] sm:$0xff]  ;;  %1511 = vmatpush.xpose.msk.msra.mxu1 %vm180_vm0, %v58_v1  ;;  %v73_v6 = vld [vmem:[%s2651_s0 + $0x170] sm:$0xff]  ;;  %v72_v10 = vld [vmem:[%s2651_s0 + $0x168] sm:$0xff] }
   0x4   :  { %v90_v3 = vld [vmem:[%s2651_s0 + $0x1f8] sm:$0xff]  ;;  %1531 = vmatpush.xpose.msk.msra.mxu2 %vm180_vm0, %v74_v2  ;;  %v89_v7 = vld [vmem:[%s2651_s0 + $0x1f0] sm:$0xff]  ;;  %v88_v11 = vld [vmem:[%s2651_s0 + $0x1e8] sm:$0xff] }
   0x5   :  { %1551 = vmatpush.xpose.msk.msra.mxu3 %vm180_vm0, %v90_v3  ;;  %v39_v12 = vld [vmem:[%s2651_s0 + $0x60] sm:$0xff]  ;;  %v38_v16 = vld [vmem:[%s2651_s0 + $0x58] sm:$0xff] }
   0x6   :  { %1492 = vmatpush.xpose.msk.msra.mxu0 %vm180_vm0, %v41_v4  ;;  %v55_v13 = vld [vmem:[%s2651_s0 + $0xe0] sm:$0xff]  ;;  %v54_v17 = vld [vmem:[%s2651_s0 + $0xd8] sm:$0xff] }
   0x7   :  { %1512 = vmatpush.xpose.msk.msra.mxu1 %vm180_vm0, %v57_v5  ;;  %v71_v14 = vld [vmem:[%s2651_s0 + $0x160] sm:$0xff]  ;;  %v70_v18 = vld [vmem:[%s2651_s0 + $0x158] sm:$0xff] }
   0x8   :  { %1532 = vmatpush.xpose.msk.msra.mxu2 %vm180_vm0, %v73_v6  ;;  %v87_v15 = vld [vmem:[%s2651_s0 + $0x1e0] sm:$0xff]  ;;  %v86_v19 = vld [vmem:[%s2651_s0 + $0x1d8] sm:$0xff] }
   0x9   :  { %1552 = vmatpush.xpose.msk.msra.mxu3 %vm180_vm0, %v89_v7 }
   0xa   :  { %1493 = vmatpush.xpose.msk.msra.mxu0 %vm180_vm0, %v40_v8 }
   0xb   :  { %1513 = vmatpush.xpose.msk.msra.mxu1 %vm180_vm0, %v56_v9 }
   0xc   :  { %1533 = vmatpush.xpose.msk.msra.mxu2 %vm180_vm0, %v72_v10 }
   0xd   :  { %1553 = vmatpush.xpose.msk.msra.mxu3 %vm180_vm0, %v88_v11 }
   0xe   :  { %1494 = vmatpush.xpose.msk.msra.mxu0 %vm180_vm0, %v39_v12 }
   0xf   :  { %1514 = vmatpush.xpose.msk.msra.mxu1 %vm180_vm0, %v55_v13 }
  0x10   :  { %1534 = vmatpush.xpose.msk.msra.mxu2 %vm180_vm0, %v71_v14 }
  0x11   :  { %1554 = vmatpush.xpose.msk.msra.mxu3 %vm180_vm0, %v87_v15 }
  0x12   :  { %12 = vsyncpa [#allocation3], 0  ;;  %1495 = vmatpush.xpose.msk.msra.mxu0 %vm180_vm0, %v38_v16  ;;  %v37_v20 = vld [vmem:[%s2651_s0 + $0x50] sm:$0xff]  ;;  %v36_v24 = vld [vmem:[%s2651_s0 + $0x48] sm:$0xff]  ;;  %v1751_v15 = vmov 0   ;;  %vm860_vm1 = vcmask 261120  }
  0x13   :  { %1515 = vmatpush.xpose.msk.msra.mxu1 %vm180_vm0, %v54_v17  ;;  %v53_v21 = vld [vmem:[%s2651_s0 + $0xd0] sm:$0xff]  ;;  %v52_v25 = vld [vmem:[%s2651_s0 + $0xc8] sm:$0xff]  ;;  %v35_v28 = vld [vmem:[%s2651_s0 + $0x40] sm:$0xff]  ;;  %1690 = vset.pattern.permute.xlu0 %v1751_v15  ;;  %vm1322_vm2 = vcmask 1040384   ;;  %vm1324_vm3 = vcmask 1042434   ;;  %vm1326_vm4 = vcmask 1041408  }
  0x14   :  { %1535 = vmatpush.xpose.msk.msra.mxu2 %vm180_vm0, %v70_v18  ;;  %v69_v22 = vld [vmem:[%s2651_s0 + $0x150] sm:$0xff]  ;;  %v68_v26 = vld [vmem:[%s2651_s0 + $0x148] sm:$0xff]  ;;  %v51_v29 = vld [vmem:[%s2651_s0 + $0xc0] sm:$0xff]  ;;  %1691 = vset.pattern.permute.xlu1 %v1751_v15  ;;  %vm1328_vm13 = vcmask 1044484   ;;  %vm1330_vm14 = vcmask 1046534   ;;  %vm1332_vm15 = vcmask 1045508  }
  0x15   :  { %1555 = vmatpush.xpose.msk.msra.mxu3 %vm180_vm0, %v86_v19  ;;  %v85_v23 = vld [vmem:[%s2651_s0 + $0x1d0] sm:$0xff]  ;;  %v84_v27 = vld [vmem:[%s2651_s0 + $0x1c8] sm:$0xff]  ;;  %v67_v30 = vld [vmem:[%s2651_s0 + $0x140] sm:$0xff]  ;;  %1692 = vset.pattern.permute.xlu2 %v1751_v15  ;;  %s1482_s24 = sshll.u32 %s2658_s7, 4  ;;  %s1483_s24 = int_to_ptr.hbm [resolvable:$true] %s1482_s24 }
  0x16   :  { %1496 = vmatpush.xpose.msk.msra.mxu0 %vm180_vm0, %v37_v20  ;;  %v83_v31 = vld [vmem:[%s2651_s0 + $0x1c0] sm:$0xff]  ;;  %v34_v32 = vld [vmem:[%s2651_s0 + $0x38] sm:$0xff]  ;;  %v33_v36 = vld [vmem:[%s2651_s0 + $0x30] sm:$0xff] }
  0x17   :  { %1516 = vmatpush.xpose.msk.msra.mxu1 %vm180_vm0, %v53_v21  ;;  %v50_v33 = vld [vmem:[%s2651_s0 + $0xb8] sm:$0xff]  ;;  %v49_v37 = vld [vmem:[%s2651_s0 + $0xb0] sm:$0xff]  ;;  %v32_v40 = vld [vmem:[%s2651_s0 + $0x28] sm:$0xff] }
  0x18   :  { %1536 = vmatpush.xpose.msk.msra.mxu2 %vm180_vm0, %v69_v22  ;;  %v66_v34 = vld [vmem:[%s2651_s0 + $0x138] sm:$0xff]  ;;  %v65_v38 = vld [vmem:[%s2651_s0 + $0x130] sm:$0xff]  ;;  %v48_v41 = vld [vmem:[%s2651_s0 + $0xa8] sm:$0xff] }
  0x19   :  { %1556 = vmatpush.xpose.msk.msra.mxu3 %vm180_vm0, %v85_v23  ;;  %v82_v35 = vld [vmem:[%s2651_s0 + $0x1b8] sm:$0xff]  ;;  %v81_v39 = vld [vmem:[%s2651_s0 + $0x1b0] sm:$0xff]  ;;  %v64_v42 = vld [vmem:[%s2651_s0 + $0x128] sm:$0xff] }
  0x1a   :  { %1497 = vmatpush.xpose.msk.msra.mxu0 %vm180_vm0, %v36_v24  ;;  %v80_v43 = vld [vmem:[%s2651_s0 + $0x1a8] sm:$0xff]  ;;  %v31_v44 = vld [vmem:[%s2651_s0 + $0x20] sm:$0xff]  ;;  %v30_v48 = vld [vmem:[%s2651_s0 + $0x18] sm:$0xff] }
  0x1b   :  { %1517 = vmatpush.xpose.msk.msra.mxu1 %vm180_vm0, %v52_v25  ;;  %v47_v45 = vld [vmem:[%s2651_s0 + $0xa0] sm:$0xff]  ;;  %v46_v49 = vld [vmem:[%s2651_s0 + $0x98] sm:$0xff]  ;;  %v29_v52 = vld [vmem:[%s2651_s0 + $0x10] sm:$0xff] }
  0x1c   :  { %1537 = vmatpush.xpose.msk.msra.mxu2 %vm180_vm0, %v68_v26  ;;  %v63_v46 = vld [vmem:[%s2651_s0 + $0x120] sm:$0xff]  ;;  %v62_v50 = vld [vmem:[%s2651_s0 + $0x118] sm:$0xff]  ;;  %v45_v53 = vld [vmem:[%s2651_s0 + $0x90] sm:$0xff] }
  0x1d   :  { %1557 = vmatpush.xpose.msk.msra.mxu3 %vm180_vm0, %v84_v27  ;;  %v79_v47 = vld [vmem:[%s2651_s0 + $0x1a0] sm:$0xff]  ;;  %v78_v51 = vld [vmem:[%s2651_s0 + $0x198] sm:$0xff]  ;;  %v61_v54 = vld [vmem:[%s2651_s0 + $0x110] sm:$0xff] }
  0x1e   :  { %1498 = vmatpush.xpose.msk.msra.mxu0 %vm180_vm0, %v35_v28  ;;  %v77_v55 = vld [vmem:[%s2651_s0 + $0x190] sm:$0xff]  ;;  %v28_v56 = vld [vmem:[%s2651_s0 + $0x8] sm:$0xff]  ;;  %v27_v60 = vld [vmem:[%s2651_s0] sm:$0xff] }
  0x1f   :  { %1518 = vmatpush.xpose.msk.msra.mxu1 %vm180_vm0, %v51_v29  ;;  %v44_v57 = vld [vmem:[%s2651_s0 + $0x88] sm:$0xff]  ;;  %v43_v61 = vld [vmem:[%s2651_s0 + $0x80] sm:$0xff]  ;;  %v106_v0 = vld [vmem:[%s2651_s0 + $0x278] sm:$0xff] }
  0x20   :  { %1538 = vmatpush.xpose.msk.msra.mxu2 %vm180_vm0, %v67_v30  ;;  %v60_v58 = vld [vmem:[%s2651_s0 + $0x108] sm:$0xff]  ;;  %v59_v62 = vld [vmem:[%s2651_s0 + $0x100] sm:$0xff]  ;;  %v122_v1 = vld [vmem:[%s2651_s0 + $0x2f8] sm:$0xff] }
  0x21   :  { %1558 = vmatpush.xpose.msk.msra.mxu3 %vm180_vm0, %v83_v31  ;;  %v76_v59 = vld [vmem:[%s2651_s0 + $0x188] sm:$0xff]  ;;  %v75_v63 = vld [vmem:[%s2651_s0 + $0x180] sm:$0xff]  ;;  %v138_v2 = vld [vmem:[%s2651_s0 + $0x378] sm:$0xff] }
  0x22   :  { %1499 = vmatpush.xpose.msk.msra.mxu0 %vm180_vm0, %v34_v32  ;;  %v151_v3 = vld [vmem:[%s2651_s0 + $0x3e0] sm:$0xff]  ;;  %v105_v5 = vld [vmem:[%s2651_s0 + $0x270] sm:$0xff]  ;;  %v150_v8 = vld [vmem:[%s2651_s0 + $0x3d8] sm:$0xff] }
  0x23   :  { %1519 = vmatpush.xpose.msk.msra.mxu1 %vm180_vm0, %v50_v33  ;;  %v2064_v4 = vld [vmem:[%s2652_s1] sm:$0xff]  ;;  %v121_v6 = vld [vmem:[%s2651_s0 + $0x2f0] sm:$0xff]  ;;  %v159_v9 = vld [vmem:[%s2653_s2 + $0x18] sm:$0xff] }
  0x24   :  { %1539 = vmatpush.xpose.msk.msra.mxu2 %vm180_vm0, %v66_v34  ;;  %v137_v7 = vld [vmem:[%s2651_s0 + $0x370] sm:$0xff]  ;;  %v157_v10 = vld [vmem:[%s2653_s2 + $0x8] sm:$0xff]  ;;  %177 = vperm.xlu0 %1690, %v159_v9   ;;  %v103_v17 = vld [vmem:[%s2651_s0 + $0x260] sm:$0xff] }
  0x25   :  { %1559 = vmatpush.xpose.msk.msra.mxu3 %vm180_vm0, %v82_v35  ;;  %v104_v11 = vld [vmem:[%s2651_s0 + $0x268] sm:$0xff]  ;;  %v149_v14 = vld [vmem:[%s2651_s0 + $0x3d0] sm:$0xff]  ;;  %167 = vperm.xlu1 %1691, %v157_v10   ;;  %v119_v18 = vld [vmem:[%s2651_s0 + $0x2e0] sm:$0xff] }
  0x26   :  { %1500 = vmatpush.xpose.msk.msra.mxu0 %vm180_vm0, %v33_v36  ;;  %v120_v12 = vld [vmem:[%s2651_s0 + $0x2e8] sm:$0xff]  ;;  %v135_v19 = vld [vmem:[%s2651_s0 + $0x360] sm:$0xff]  ;;  %v158_v21 = vld [vmem:[%s2653_s2 + $0x10] sm:$0xff] }
  0x27   :  { %1520 = vmatpush.xpose.msk.msra.mxu1 %vm180_vm0, %v49_v37  ;;  %v136_v13 = vld [vmem:[%s2651_s0 + $0x368] sm:$0xff]  ;;  %v156_v22 = vld [vmem:[%s2653_s2] sm:$0xff]  ;;  %v102_v23 = vld [vmem:[%s2651_s0 + $0x258] sm:$0xff] }
  0x28   :  { %1540 = vmatpush.xpose.msk.msra.mxu2 %vm180_vm0, %v65_v38  ;;  %v2115_v16 = vld [vmem:[%s2652_s1 + $0x8] sm:$0xff]  ;;  %v118_v24 = vld [vmem:[%s2651_s0 + $0x2d8] sm:$0xff]  ;;  %v147_v26 = vld [vmem:[%s2651_s0 + $0x3c0] sm:$0xff] }
  0x29   :  { %1560 = vmatpush.xpose.msk.msra.mxu3 %vm180_vm0, %v81_v39  ;;  %v148_v20 = vld [vmem:[%s2651_s0 + $0x3c8] sm:$0xff]  ;;  %v134_v25 = vld [vmem:[%s2651_s0 + $0x358] sm:$0xff]  ;;  %v2166_v27 = vld [vmem:[%s2652_s1 + $0x10] sm:$0xff] }
  0x2a   :  { %1501 = vmatpush.xpose.msk.msra.mxu0 %vm180_vm0, %v32_v40  ;;  %v101_v28 = vld [vmem:[%s2651_s0 + $0x250] sm:$0xff]  ;;  %v146_v31 = vld [vmem:[%s2651_s0 + $0x3b8] sm:$0xff]  ;;  %v100_v32 = vld [vmem:[%s2651_s0 + $0x248] sm:$0xff] }
  0x2b   :  { %1521 = vmatpush.xpose.msk.msra.mxu1 %vm180_vm0, %v48_v41  ;;  %v117_v29 = vld [vmem:[%s2651_s0 + $0x2d0] sm:$0xff]  ;;  %v116_v33 = vld [vmem:[%s2651_s0 + $0x2c8] sm:$0xff]  ;;  %v2211_v36 = vld [vmem:[%s2652_s1 + $0x18] sm:$0xff] }
  0x2c   :  { %1541 = vmatpush.xpose.msk.msra.mxu2 %vm180_vm0, %v64_v42  ;;  %172 = vperm.xlu0 %1690, %v158_v21   ;;  %v133_v30 = vld [vmem:[%s2651_s0 + $0x350] sm:$0xff]  ;;  %v132_v34 = vld [vmem:[%s2651_s0 + $0x348] sm:$0xff]  ;;  %v99_v37 = vld [vmem:[%s2651_s0 + $0x240] sm:$0xff] }
  0x2d   :  { %1561 = vmatpush.xpose.msk.msra.mxu3 %vm180_vm0, %v80_v43  ;;  %162 = vperm.xlu1 %1691, %v156_v22   ;;  %v145_v35 = vld [vmem:[%s2651_s0 + $0x3b0] sm:$0xff]  ;;  %v115_v38 = vld [vmem:[%s2651_s0 + $0x2c0] sm:$0xff]  ;;  %v144_v40 = vld [vmem:[%s2651_s0 + $0x3a8] sm:$0xff] }
  0x2e   :  { %1502 = vmatpush.xpose.msk.msra.mxu0 %vm180_vm0, %v31_v44  ;;  %v131_v39 = vld [vmem:[%s2651_s0 + $0x340] sm:$0xff]  ;;  %v837_v41 = vld [vmem:[%s2655_s4 + $0x8] sm:$0xff]  ;;  %v98_v42 = vld [vmem:[%s2651_s0 + $0x238] sm:$0xff] }
  0x2f   :  { %1522 = vmatpush.xpose.msk.msra.mxu1 %vm180_vm0, %v47_v45  ;;  %v114_v43 = vld [vmem:[%s2651_s0 + $0x2b8] sm:$0xff]  ;;  %v143_v45 = vld [vmem:[%s2651_s0 + $0x3a0] sm:$0xff] }
  0x30   :  { %1542 = vmatpush.xpose.msk.msra.mxu2 %vm180_vm0, %v63_v46  ;;  %v130_v44 = vld [vmem:[%s2651_s0 + $0x338] sm:$0xff]  ;;  %v836_v46 = vld [vmem:[%s2655_s4] sm:$0xff] }
  0x31   :  { %1562 = vmatpush.xpose.msk.msra.mxu3 %vm180_vm0, %v79_v47  ;;  %v97_v47 = vld [vmem:[%s2651_s0 + $0x230] sm:$0xff] }
  0x32   :  { %1503 = vmatpush.xpose.msk.msra.mxu0 %vm180_vm0, %v30_v48  ;;  %v113_v48 = vld [vmem:[%s2651_s0 + $0x2b0] sm:$0xff] }
  0x33   :  { %1523 = vmatpush.xpose.msk.msra.mxu1 %vm180_vm0, %v46_v49  ;;  %v129_v49 = vld [vmem:[%s2651_s0 + $0x330] sm:$0xff] }
  0x34   :  { %1543 = vmatpush.xpose.msk.msra.mxu2 %vm180_vm0, %v62_v50  ;;  %847 = vperm.xlu0 %1690, %v837_v41   ;;  %v142_v50 = vld [vmem:[%s2651_s0 + $0x398] sm:$0xff] }
  0x35   :  { %1563 = vmatpush.xpose.msk.msra.mxu3 %vm180_vm0, %v78_v51  ;;  %842 = vperm.xlu1 %1691, %v836_v46   ;;  %v96_v51 = vld [vmem:[%s2651_s0 + $0x228] sm:$0xff] }
  0x36   :  { %1504 = vmatpush.xpose.msk.msra.mxu0 %vm180_vm0, %v29_v52  ;;  %v112_v52 = vld [vmem:[%s2651_s0 + $0x2a8] sm:$0xff] }
  0x37   :  { %1524 = vmatpush.xpose.msk.msra.mxu1 %vm180_vm0, %v45_v53  ;;  %v128_v53 = vld [vmem:[%s2651_s0 + $0x328] sm:$0xff] }
  0x38   :  { %1544 = vmatpush.xpose.msk.msra.mxu2 %vm180_vm0, %v61_v54  ;;  %v141_v54 = vld [vmem:[%s2651_s0 + $0x390] sm:$0xff] }
  0x39   :  { %1564 = vmatpush.xpose.msk.msra.mxu3 %vm180_vm0, %v77_v55  ;;  %v95_v55 = vld [vmem:[%s2651_s0 + $0x220] sm:$0xff] }
  0x3a   :  { %1505 = vmatpush.xpose.msk.msra.mxu0 %vm180_vm0, %v28_v56  ;;  %v111_v56 = vld [vmem:[%s2651_s0 + $0x2a0] sm:$0xff] }
  0x3b   :  { %1525 = vmatpush.xpose.msk.msra.mxu1 %vm180_vm0, %v44_v57  ;;  %v127_v57 = vld [vmem:[%s2651_s0 + $0x320] sm:$0xff] }
  0x3c   :  { %1545 = vmatpush.xpose.msk.msra.mxu2 %vm180_vm0, %v60_v58  ;;  %v140_v58 = vld [vmem:[%s2651_s0 + $0x388] sm:$0xff] }
  0x3d   :  { %1565 = vmatpush.xpose.msk.msra.mxu3 %vm180_vm0, %v76_v59  ;;  %v94_v59 = vld [vmem:[%s2651_s0 + $0x218] sm:$0xff] }
  0x3e   :  { %1506 = vmatpush.xpose.msk.msra.mxu0 %vm180_vm0, %v27_v60  ;;  %v110_v60 = vld [vmem:[%s2651_s0 + $0x298] sm:$0xff] }
  0x3f   :  { %1526 = vmatpush.xpose.msk.msra.mxu1 %vm180_vm0, %v43_v61  ;;  %v126_v61 = vld [vmem:[%s2651_s0 + $0x318] sm:$0xff] }
  0x40   :  { %1546 = vmatpush.xpose.msk.msra.mxu2 %vm180_vm0, %v59_v62  ;;  %v139_v62 = vld [vmem:[%s2651_s0 + $0x380] sm:$0xff] }
  0x41   :  { %1566 = vmatpush.xpose.msk.msra.mxu3 %vm180_vm0, %v75_v63  ;;  %1507 = vmatmul.msk.f32.vlgmr.msra.gmra.mxu0 %vm180_vm0, %v2064_v4  ;;  %v93_v63 = vld [vmem:[%s2651_s0 + $0x210] sm:$0xff] }
  0x42   :  { %1571 = vmatpush.xpose.msk.msrb.mxu0 %vm180_vm0, %v106_v0  ;;  %1527 = vmatmul.msk.f32.vlgmr.msra.gmra.mxu1 %vm180_vm0, %v2064_v4  ;;  %v109_v0 = vld [vmem:[%s2651_s0 + $0x290] sm:$0xff] }
  0x43   :  { %1591 = vmatpush.xpose.msk.msrb.mxu1 %vm180_vm0, %v122_v1  ;;  %1547 = vmatmul.msk.f32.vlgmr.msra.gmra.mxu2 %vm180_vm0, %v2064_v4  ;;  %v125_v1 = vld [vmem:[%s2651_s0 + $0x310] sm:$0xff] }
  0x44   :  { %1611 = vmatpush.xpose.msk.msrb.mxu2 %vm180_vm0, %v138_v2  ;;  %1567 = vmatmul.msk.f32.vlgmr.msra.gmra.mxu3 %vm180_vm0, %v2064_v4  ;;  %v92_v2 = vld [vmem:[%s2651_s0 + $0x208] sm:$0xff] }
  0x45   :  { %1631 = vmatpush.xpose.msk.msrb.mxu3 %vm180_vm0, %v151_v3  ;;  %v108_v3 = vld [vmem:[%s2651_s0 + $0x288] sm:$0xff] }
  0x46   :  { %1572 = vmatpush.xpose.msk.msrb.mxu0 %vm180_vm0, %v105_v5  ;;  %v124_v5 = vld [vmem:[%s2651_s0 + $0x308] sm:$0xff] }
  0x47   :  { %1592 = vmatpush.xpose.msk.msrb.mxu1 %vm180_vm0, %v121_v6  ;;  %v91_v6 = vld [vmem:[%s2651_s0 + $0x200] sm:$0xff] }
  0x48   :  { %1612 = vmatpush.xpose.msk.msrb.mxu2 %vm180_vm0, %v137_v7  ;;  %v107_v7 = vld [vmem:[%s2651_s0 + $0x280] sm:$0xff] }
  0x49   :  { %1632 = vmatpush.xpose.msk.msrb.mxu3 %vm180_vm0, %v150_v8  ;;  %1508 = vmatmul.msk.f32.gmra.mxu0 %vm180_vm0, %v2115_v16  ;;  %v123_v8 = vld [vmem:[%s2651_s0 + $0x300] sm:$0xff] }
  0x4a   :  { %1573 = vmatpush.xpose.msk.msrb.mxu0 %vm180_vm0, %v104_v11  ;;  %1528 = vmatmul.msk.f32.gmra.mxu1 %vm180_vm0, %v2115_v16 }
  0x4b   :  { %1593 = vmatpush.xpose.msk.msrb.mxu1 %vm180_vm0, %v120_v12  ;;  %1548 = vmatmul.msk.f32.gmra.mxu2 %vm180_vm0, %v2115_v16 }
  0x4c   :  { %1613 = vmatpush.xpose.msk.msrb.mxu2 %vm180_vm0, %v136_v13  ;;  %1568 = vmatmul.msk.f32.gmra.mxu3 %vm180_vm0, %v2115_v16 }
  0x4d   :  { %1633 = vmatpush.xpose.msk.msrb.mxu3 %vm180_vm0, %v149_v14 }
  0x4e   :  { %1574 = vmatpush.xpose.msk.msrb.mxu0 %vm180_vm0, %v103_v17 }
  0x4f   :  { %1594 = vmatpush.xpose.msk.msrb.mxu1 %vm180_vm0, %v119_v18 }
  0x50   :  { %1614 = vmatpush.xpose.msk.msrb.mxu2 %vm180_vm0, %v135_v19 }
  0x51   :  { %1634 = vmatpush.xpose.msk.msrb.mxu3 %vm180_vm0, %v148_v20  ;;  %1509 = vmatmul.msk.f32.gmra.mxu0 %vm180_vm0, %v2166_v27 }
  0x52   :  { %1575 = vmatpush.xpose.msk.msrb.mxu0 %vm180_vm0, %v102_v23  ;;  %1529 = vmatmul.msk.f32.gmra.mxu1 %vm180_vm0, %v2166_v27 }
  0x53   :  { %1595 = vmatpush.xpose.msk.msrb.mxu1 %vm180_vm0, %v118_v24  ;;  %1549 = vmatmul.msk.f32.gmra.mxu2 %vm180_vm0, %v2166_v27 }
  0x54   :  { %1615 = vmatpush.xpose.msk.msrb.mxu2 %vm180_vm0, %v134_v25  ;;  %1569 = vmatmul.msk.f32.gmra.mxu3 %vm180_vm0, %v2166_v27 }
  0x55   :  { %1635 = vmatpush.xpose.msk.msrb.mxu3 %vm180_vm0, %v147_v26 }
  0x56   :  { %1576 = vmatpush.xpose.msk.msrb.mxu0 %vm180_vm0, %v101_v28 }
  0x57   :  { %1596 = vmatpush.xpose.msk.msrb.mxu1 %vm180_vm0, %v117_v29 }
  0x58   :  { %1616 = vmatpush.xpose.msk.msrb.mxu2 %vm180_vm0, %v133_v30 }
  0x59   :  { %1636 = vmatpush.xpose.msk.msrb.mxu3 %vm180_vm0, %v146_v31  ;;  %1510 = vmatmul.msk.f32.gmra.mxu0 %vm180_vm0, %v2211_v36 }
  0x5a   :  { %1577 = vmatpush.xpose.msk.msrb.mxu0 %vm180_vm0, %v100_v32  ;;  %1530 = vmatmul.msk.f32.gmra.mxu1 %vm180_vm0, %v2211_v36 }
  0x5b   :  { %1597 = vmatpush.xpose.msk.msrb.mxu1 %vm180_vm0, %v116_v33  ;;  %1550 = vmatmul.msk.f32.gmra.mxu2 %vm180_vm0, %v2211_v36 }
  0x5c   :  { %1617 = vmatpush.xpose.msk.msrb.mxu2 %vm180_vm0, %v132_v34  ;;  %1570 = vmatmul.msk.f32.gmra.mxu3 %vm180_vm0, %v2211_v36 }
  0x5d   :  { %1637 = vmatpush.xpose.msk.msrb.mxu3 %vm180_vm0, %v145_v35 }
  0x5e   :  { %1578 = vmatpush.xpose.msk.msrb.mxu0 %vm180_vm0, %v99_v37 }
  0x5f   :  { %1598 = vmatpush.xpose.msk.msrb.mxu1 %vm180_vm0, %v115_v38 }
  0x60   :  { %1618 = vmatpush.xpose.msk.msrb.mxu2 %vm180_vm0, %v131_v39 }
  0x61   :  { %1638 = vmatpush.xpose.msk.msrb.mxu3 %vm180_vm0, %v144_v40 }
  0x62   :  { %1579 = vmatpush.xpose.msk.msrb.mxu0 %vm180_vm0, %v98_v42 }
  0x63   :  { %1599 = vmatpush.xpose.msk.msrb.mxu1 %vm180_vm0, %v114_v43 }
  0x64   :  { %1619 = vmatpush.xpose.msk.msrb.mxu2 %vm180_vm0, %v130_v44 }
  0x65   :  { %1639 = vmatpush.xpose.msk.msrb.mxu3 %vm180_vm0, %v143_v45 }
  0x66   :  { %1580 = vmatpush.xpose.msk.msrb.mxu0 %vm180_vm0, %v97_v47 }
  0x67   :  { %1600 = vmatpush.xpose.msk.msrb.mxu1 %vm180_vm0, %v113_v48 }
  0x68   :  { %1620 = vmatpush.xpose.msk.msrb.mxu2 %vm180_vm0, %v129_v49 }
  0x69   :  { %1640 = vmatpush.xpose.msk.msrb.mxu3 %vm180_vm0, %v142_v50 }
  0x6a   :  { %1581 = vmatpush.xpose.msk.msrb.mxu0 %vm180_vm0, %v96_v51 }
  0x6b   :  { %1601 = vmatpush.xpose.msk.msrb.mxu1 %vm180_vm0, %v112_v52 }
  0x6c   :  { %1621 = vmatpush.xpose.msk.msrb.mxu2 %vm180_vm0, %v128_v53 }
  0x6d   :  { %1641 = vmatpush.xpose.msk.msrb.mxu3 %vm180_vm0, %v141_v54  ;;  %v2422_v54 = vld [vmem:[%s2654_s3] sm:$0xff] }
  0x6e   :  { %1582 = vmatpush.xpose.msk.msrb.mxu0 %vm180_vm0, %v95_v55 }
  0x6f   :  { %1602 = vmatpush.xpose.msk.msrb.mxu1 %vm180_vm0, %v111_v56 }
  0x70   :  { %1622 = vmatpush.xpose.msk.msrb.mxu2 %vm180_vm0, %v127_v57 }
  0x71   :  { %1642 = vmatpush.xpose.msk.msrb.mxu3 %vm180_vm0, %v140_v58 }
  0x72   :  { %1583 = vmatpush.xpose.msk.msrb.mxu0 %vm180_vm0, %v94_v59 }
  0x73   :  { %1603 = vmatpush.xpose.msk.msrb.mxu1 %vm180_vm0, %v110_v60 }
  0x74   :  { %1623 = vmatpush.xpose.msk.msrb.mxu2 %vm180_vm0, %v126_v61  ;;  %v2431_v61 = vld [vmem:[%s2654_s3 + $0x8] sm:$0xff] }
  0x75   :  { %1643 = vmatpush.xpose.msk.msrb.mxu3 %vm180_vm0, %v139_v62  ;;  %v2444_v62 = vld [vmem:[%s2654_s3 + $0x10] sm:$0xff] }
  0x76   :  { %1584 = vmatpush.xpose.msk.msrb.mxu0 %vm180_vm0, %v93_v63 }
  0x77   :  { %1604 = vmatpush.xpose.msk.msrb.mxu1 %vm180_vm0, %v109_v0  ;;  %v2457_v0 = vld [vmem:[%s2654_s3 + $0x18] sm:$0xff] }
  0x78   :  { %1644 = vmatmul.msk.f32.vlgmr.msrb.gmra.mxu3 %vm180_vm0, %v2064_v4  ;;  %1624 = vmatpush.xpose.msk.msrb.mxu2 %vm180_vm0, %v125_v1 }
  0x7a   :  { %1585 = vmatpush.xpose.msk.msrb.mxu0 %vm180_vm0, %v92_v2 }
  0x7b   :  { %1605 = vmatpush.xpose.msk.msrb.mxu1 %vm180_vm0, %v108_v3  ;;  %v839_v3 = vld [vmem:[%s2655_s4 + $0x18] sm:$0xff] }
  0x7c   :  { %1625 = vmatpush.xpose.msk.msrb.mxu2 %vm180_vm0, %v124_v5  ;;  %857 = vperm.xlu2 %1692, %v839_v3  }
  0x7e   :  { %1586 = vmatpush.xpose.msk.msrb.mxu0 %vm180_vm0, %v91_v6 }
  0x7f   :  { %1606 = vmatpush.xpose.msk.msrb.mxu1 %vm180_vm0, %v107_v7 }
  0x80   :  { %1645 = vmatmul.msk.f32.gmra.mxu3 %vm180_vm0, %v2115_v16  ;;  %1626 = vmatpush.xpose.msk.msrb.mxu2 %vm180_vm0, %v123_v8 }
  0x81   :  { %1587 = vmatmul.msk.f32.vlgmr.msrb.gmra.mxu0 %vm180_vm0, %v2064_v4 }
  0x82   :  { %1607 = vmatmul.msk.f32.vlgmr.msrb.gmra.mxu1 %vm180_vm0, %v2064_v4 }
  0x83   :  { %1627 = vmatmul.msk.f32.vlgmr.msrb.gmra.mxu2 %vm180_vm0, %v2064_v4 }
  0x88   :  { %1646 = vmatmul.msk.f32.gmra.mxu3 %vm180_vm0, %v2166_v27 }
  0x89   :  { %1588 = vmatmul.msk.f32.gmra.mxu0 %vm180_vm0, %v2115_v16 }
  0x8a   :  { %1608 = vmatmul.msk.f32.gmra.mxu1 %vm180_vm0, %v2115_v16 }
  0x8b   :  { %1628 = vmatmul.msk.f32.gmra.mxu2 %vm180_vm0, %v2115_v16 }
  0x90   :  { %1647 = vmatmul.msk.f32.gmra.mxu3 %vm180_vm0, %v2211_v36 }
  0x91   :  { %1589 = vmatmul.msk.f32.gmra.mxu0 %vm180_vm0, %v2166_v27 }
  0x92   :  { %1609 = vmatmul.msk.f32.gmra.mxu1 %vm180_vm0, %v2166_v27 }
  0x93   :  { %1629 = vmatmul.msk.f32.gmra.mxu2 %vm180_vm0, %v2166_v27 }
  0x96   :  { %v2395_v14 = vpop.permute.xlu0 %177 }
  0x97   :  { %v2397_v15 = vpop.permute.xlu1 %167 }
  0x99   :  { %1590 = vmatmul.msk.f32.gmra.mxu0 %vm180_vm0, %v2211_v36 }
  0x9a   :  { %1610 = vmatmul.msk.f32.gmra.mxu1 %vm180_vm0, %v2211_v36 }
  0x9b   :  { %1630 = vmatmul.msk.f32.gmra.mxu2 %vm180_vm0, %v2211_v36  ;;  %vm1334_vm0 = vcmask 1043456  }
  0x9e   :  { %v2399_v20 = vpop.permute.xlu0 %172 }
  0x9f   :  { %v2401_v21 = vpop.permute.xlu1 %162 }
  0xbe   :  { %v585_v4 = vpop.f32.mrf.mxu0 }
  0xbf   :  { %v614_v9 = vpop.f32.mrf.mxu1  ;;  %v586_v32 = vadd.f32 %v585_v4, %v2401_v21  ;;  %v838_v4 = vld [vmem:[%s2655_s4 + $0x10] sm:$0xff] }
  0xc0   :  { %v615_v33 = vadd.f32 %v614_v9, %v2401_v21  ;;  %852 = vperm.xlu2 %1692, %v838_v4  }
  0xc1   :  { %v800_v44 = vmax.f32 %v586_v32, 0.0 }
  0xc2   :  { %v801_v45 = vmax.f32 %v615_v33, 0.0 }
  0xc6   :  { %v643_v10 = vpop.f32.mrf.mxu2  ;;  %v588_v12 = vpop.f32.mrf.mxu0 }
  0xc7   :  { %v672_v11 = vpop.f32.mrf.mxu3  ;;  %v617_v13 = vpop.f32.mrf.mxu1  ;;  %v589_v30 = vadd.f32 %v588_v12, %v2397_v15  ;;  %v644_v50 = vadd.f32 %v643_v10, %v2401_v21 }
  0xc8   :  { %v618_v31 = vadd.f32 %v617_v13, %v2397_v15  ;;  %v673_v51 = vadd.f32 %v672_v11, %v2401_v21 }
  0xc9   :  { %v808_v38 = vmax.f32 %v589_v30, 0.0  ;;  %v802_v59 = vmax.f32 %v644_v50, 0.0  ;;  %v1138_v50 = vld [vmem:[%s2657_s6] sm:$0x3] }
  0xca   :  { %v809_v39 = vmax.f32 %v618_v31, 0.0  ;;  %v803_v60 = vmax.f32 %v673_v51, 0.0  ;;  %1141 = vperm.xlu2 %1692, %v1138_v50  }
  0xce   :  { %v646_v16 = vpop.f32.mrf.mxu2  ;;  %v591_v18 = vpop.f32.mrf.mxu0 }
  0xcf   :  { %v675_v17 = vpop.f32.mrf.mxu3  ;;  %v620_v19 = vpop.f32.mrf.mxu1  ;;  %v592_v24 = vadd.f32 %v591_v18, %v2399_v20  ;;  %v647_v48 = vadd.f32 %v646_v16, %v2397_v15 }
  0xd0   :  { %v621_v25 = vadd.f32 %v620_v19, %v2399_v20  ;;  %v676_v49 = vadd.f32 %v675_v17, %v2397_v15 }
  0xd1   :  { %v816_v36 = vmax.f32 %v592_v24, 0.0  ;;  %v810_v57 = vmax.f32 %v647_v48, 0.0 }
  0xd2   :  { %v817_v37 = vmax.f32 %v621_v25, 0.0  ;;  %v811_v58 = vmax.f32 %v676_v49, 0.0 }
  0xd6   :  { %v649_v22 = vpop.f32.mrf.mxu2  ;;  %v594_v26 = vpop.f32.mrf.mxu0 }
  0xd7   :  { %v678_v23 = vpop.f32.mrf.mxu3  ;;  %v623_v27 = vpop.f32.mrf.mxu1  ;;  %v595_v28 = vadd.f32 %v594_v26, %v2395_v14  ;;  %v650_v40 = vadd.f32 %v649_v22, %v2399_v20 }
  0xd8   :  { %v624_v29 = vadd.f32 %v623_v27, %v2395_v14  ;;  %v679_v41 = vadd.f32 %v678_v23, %v2399_v20 }
  0xd9   :  { %v824_v34 = vmax.f32 %v595_v28, 0.0  ;;  %v818_v55 = vmax.f32 %v650_v40, 0.0 }
  0xda   :  { %v825_v35 = vmax.f32 %v624_v29, 0.0  ;;  %v819_v56 = vmax.f32 %v679_v41, 0.0 }
  0xdb   :  { %885 = vmatpush.msra.mxu3 %v824_v34 }
  0xdc   :  { %914 = vmatpush.msra.mxu0 %v825_v35 }
  0xdd   :  { %886 = vmatpush.msra.mxu3 %v816_v36 }
  0xde   :  { %v652_v42 = vpop.f32.mrf.mxu2  ;;  %915 = vmatpush.msra.mxu0 %v817_v37 }
  0xdf   :  { %v681_v43 = vpop.f32.mrf.mxu3  ;;  %v653_v46 = vadd.f32 %v652_v42, %v2395_v14  ;;  %887 = vmatpush.msra.mxu3 %v808_v38 }
  0xe0   :  { %v682_v47 = vadd.f32 %v681_v43, %v2395_v14  ;;  %916 = vmatpush.msra.mxu0 %v809_v39 }
  0xe1   :  { %v826_v52 = vmax.f32 %v653_v46, 0.0  ;;  %888 = vmatpush.msra.mxu3 %v800_v44 }
  0xe2   :  { %v827_v53 = vmax.f32 %v682_v47, 0.0  ;;  %917 = vmatpush.msra.mxu0 %v801_v45  ;;  %1648 = vmatmul.msk.f32.vlgmr.msra.gmra.mxu3 %vm860_vm1, %v2422_v54 }
  0xe3   :  { %943 = vmatpush.msra.mxu1 %v826_v52  ;;  %1652 = vmatmul.msk.f32.vlgmr.msra.gmra.mxu0 %vm860_vm1, %v2422_v54 }
  0xe4   :  { %972 = vmatpush.msra.mxu2 %v827_v53 }
  0xe5   :  { %944 = vmatpush.msra.mxu1 %v818_v55 }
  0xe6   :  { %973 = vmatpush.msra.mxu2 %v819_v56 }
  0xe7   :  { %945 = vmatpush.msra.mxu1 %v810_v57 }
  0xe8   :  { %974 = vmatpush.msra.mxu2 %v811_v58  ;;  %v2528_v58 = vpop.permute.xlu2 %857 }
  0xe9   :  { %946 = vmatpush.msra.mxu1 %v802_v59 }
  0xea   :  { %975 = vmatpush.msra.mxu2 %v803_v60  ;;  %1656 = vmatmul.msk.f32.vlgmr.msra.gmra.mxu1 %vm860_vm1, %v2422_v54 }
  0xeb   :  { %1660 = vmatmul.msk.f32.vlgmr.msra.gmra.mxu2 %vm860_vm1, %v2422_v54  ;;  %1649 = vmatmul.msk.f32.gmra.mxu3 %vm860_vm1, %v2431_v61 }
  0xec   :  { %1653 = vmatmul.msk.f32.gmra.mxu0 %vm860_vm1, %v2431_v61 }
  0xf2   :  { %1657 = vmatmul.msk.f32.gmra.mxu1 %vm860_vm1, %v2431_v61 }
  0xf3   :  { %1661 = vmatmul.msk.f32.gmra.mxu2 %vm860_vm1, %v2431_v61  ;;  %1650 = vmatmul.msk.f32.gmra.mxu3 %vm860_vm1, %v2444_v62 }
  0xf4   :  { %1654 = vmatmul.msk.f32.gmra.mxu0 %vm860_vm1, %v2444_v62 }
  0xfa   :  { %1658 = vmatmul.msk.f32.gmra.mxu1 %vm860_vm1, %v2444_v62 }
  0xfb   :  { %v788_v63 = vpop.f32.mrf.mxu3  ;;  %1662 = vmatmul.msk.f32.gmra.mxu2 %vm860_vm1, %v2444_v62  ;;  %1651 = vmatmul.msk.f32.gmra.mxu3 %vm860_vm1, %v2457_v0 }
  0xfc   :  { %1655 = vmatmul.msk.f32.gmra.mxu0 %vm860_vm1, %v2457_v0  ;;  %v789_v23 = vadd.f32 %v788_v63, %v2401_v21 }
  0xfe   :  { %v701_v1 = vpop.f32.mrf.mxu0  ;;  %v807_v34 = vmax.f32 %v789_v23, 0.0 }
  0xff   :  { %v730_v2 = vpop.f32.mrf.mxu1  ;;  %v702_v37 = vadd.f32 %v701_v1, %v2401_v21 }
 0x100   :  { %v731_v39 = vadd.f32 %v730_v2, %v2401_v21 }
 0x101   :  { %v804_v46 = vmax.f32 %v702_v37, 0.0 }
 0x102   :  { %1659 = vmatmul.msk.f32.gmra.mxu1 %vm860_vm1, %v2457_v0  ;;  %v805_v47 = vmax.f32 %v731_v39, 0.0 }
 0x103   :  { %v791_v5 = vpop.f32.mrf.mxu3  ;;  %1663 = vmatmul.msk.f32.gmra.mxu2 %vm860_vm1, %v2457_v0 }
 0x104   :  { %v792_v18 = vadd.f32 %v791_v5, %v2397_v15 }
 0x106   :  { %v759_v6 = vpop.f32.mrf.mxu2  ;;  %v704_v7 = vpop.f32.mrf.mxu0  ;;  %v815_v29 = vmax.f32 %v792_v18, 0.0 }
 0x107   :  { %v733_v8 = vpop.f32.mrf.mxu1  ;;  %v705_v32 = vadd.f32 %v704_v7, %v2397_v15  ;;  %v760_v51 = vadd.f32 %v759_v6, %v2401_v21  ;;  %v2534_v6 = vpop.permute.xlu0 %847 }
 0x108   :  { %v734_v35 = vadd.f32 %v733_v8, %v2397_v15 }
 0x109   :  { %v812_v41 = vmax.f32 %v705_v32, 0.0 }
 0x10a   :  { %v813_v43 = vmax.f32 %v734_v35, 0.0 }
 0x10b   :  { %v794_v9 = vpop.f32.mrf.mxu3 }
 0x10c   :  { %v795_v16 = vadd.f32 %v794_v9, %v2399_v20 }
 0x10e   :  { %v762_v10 = vpop.f32.mrf.mxu2  ;;  %v707_v11 = vpop.f32.mrf.mxu0  ;;  %v823_v24 = vmax.f32 %v795_v16, 0.0 }
 0x10f   :  { %v736_v12 = vpop.f32.mrf.mxu1  ;;  %v708_v26 = vadd.f32 %v707_v11, %v2399_v20  ;;  %v763_v48 = vadd.f32 %v762_v10, %v2397_v15  ;;  %v806_v15 = vmax.f32 %v760_v51, 0.0 }
 0x110   :  { %v737_v30 = vadd.f32 %v736_v12, %v2399_v20 }
 0x111   :  { %v820_v38 = vmax.f32 %v708_v26, 0.0 }
 0x112   :  { %v821_v40 = vmax.f32 %v737_v30, 0.0 }
 0x113   :  { %v797_v13 = vpop.f32.mrf.mxu3 }
 0x114   :  { %v798_v17 = vadd.f32 %v797_v13, %v2395_v14 }
 0x116   :  { %v831_v19 = vmax.f32 %v798_v17, 0.0  ;;  %v765_v22 = vpop.f32.mrf.mxu2  ;;  %v710_v25 = vpop.f32.mrf.mxu0 }
 0x117   :  { %v711_v27 = vadd.f32 %v710_v25, %v2395_v14  ;;  %v739_v28 = vpop.f32.mrf.mxu1  ;;  %v766_v44 = vadd.f32 %v765_v22, %v2399_v20  ;;  %v2540_v17 = vpop.permute.xlu1 %842 }
 0x118   :  { %1088 = vmatpush.msrb.mxu2 %v831_v19  ;;  %v740_v31 = vadd.f32 %v739_v28, %v2395_v14 }
 0x119   :  { %v828_v33 = vmax.f32 %v711_v27, 0.0  ;;  %v822_v52 = vmax.f32 %v766_v44, 0.0 }
 0x11a   :  { %1089 = vmatpush.msrb.mxu2 %v823_v24  ;;  %v829_v36 = vmax.f32 %v740_v31, 0.0  ;;  %v2530_v63 = vpop.permute.xlu2 %852 }
 0x11b   :  { %1001 = vmatpush.msrb.mxu3 %v828_v33  ;;  %v2551_v33 = vld [vmem:[%s2656_s5] sm:$0x3]  ;;  %s1752_s5 = smov [#allocation2]  }
 0x11c   :  { %1090 = vmatpush.msrb.mxu2 %v815_v29  ;;  %1030 = vmatpush.msrb.mxu0 %v829_v36  ;;  %s1480_s21 = sshll.u32 %s1752_s5, 4  ;;  %s1481_s21 = int_to_ptr.vmem [resolvable:$true] %s1480_s21 }
 0x11d   :  { %1002 = vmatpush.msrb.mxu3 %v820_v38 }
 0x11e   :  { %1091 = vmatpush.msrb.mxu2 %v807_v34  ;;  %v768_v42 = vpop.f32.mrf.mxu2  ;;  %1031 = vmatpush.msrb.mxu0 %v821_v40 }
 0x11f   :  { %1676 = vmatmul.msk.f32.vlgmr.msrb.gmra.mxu2 %vm860_vm1, %v2422_v54  ;;  %v769_v45 = vadd.f32 %v768_v42, %v2395_v14  ;;  %1003 = vmatpush.msrb.mxu3 %v812_v41  ;;  %v814_v14 = vmax.f32 %v763_v48, 0.0 }
 0x120   :  { %1032 = vmatpush.msrb.mxu0 %v813_v43 }
 0x121   :  { %v830_v49 = vmax.f32 %v769_v45, 0.0  ;;  %1004 = vmatpush.msrb.mxu3 %v804_v46 }
 0x122   :  { %1033 = vmatpush.msrb.mxu0 %v805_v47  ;;  %1664 = vmatmul.msk.f32.vlgmr.msrb.gmra.mxu3 %vm860_vm1, %v2422_v54 }
 0x123   :  { %1059 = vmatpush.msrb.mxu1 %v830_v49  ;;  %1668 = vmatmul.msk.f32.vlgmr.msrb.gmra.mxu0 %vm860_vm1, %v2422_v54 }
 0x125   :  { %1060 = vmatpush.msrb.mxu1 %v822_v52 }
 0x127   :  { %1677 = vmatmul.msk.f32.gmra.mxu2 %vm860_vm1, %v2431_v61  ;;  %1061 = vmatpush.msrb.mxu1 %v814_v14 }
 0x129   :  { %1062 = vmatpush.msrb.mxu1 %v806_v15 }
 0x12a   :  { %1672 = vmatmul.msk.f32.vlgmr.msrb.gmra.mxu1 %vm860_vm1, %v2422_v54  ;;  %1665 = vmatmul.msk.f32.gmra.mxu3 %vm860_vm1, %v2431_v61 }
 0x12b   :  { %1669 = vmatmul.msk.f32.gmra.mxu0 %vm860_vm1, %v2431_v61 }
 0x12f   :  { %1678 = vmatmul.msk.f32.gmra.mxu2 %vm860_vm1, %v2444_v62 }
 0x132   :  { %1673 = vmatmul.msk.f32.gmra.mxu1 %vm860_vm1, %v2431_v61  ;;  %1666 = vmatmul.msk.f32.gmra.mxu3 %vm860_vm1, %v2444_v62 }
 0x133   :  { %1670 = vmatmul.msk.f32.gmra.mxu0 %vm860_vm1, %v2444_v62 }
 0x137   :  { %1679 = vmatmul.msk.f32.gmra.mxu2 %vm860_vm1, %v2457_v0 }
 0x13a   :  { %1674 = vmatmul.msk.f32.gmra.mxu1 %vm860_vm1, %v2444_v62  ;;  %1667 = vmatmul.msk.f32.gmra.mxu3 %vm860_vm1, %v2457_v0 }
 0x13b   :  { %1671 = vmatmul.msk.f32.gmra.mxu0 %vm860_vm1, %v2457_v0 }
 0x142   :  { %1675 = vmatmul.msk.f32.gmra.mxu1 %vm860_vm1, %v2457_v0 }
 0x160   :  { %v919_v20 = vpop.f32.mrf.mxu0 }
 0x161   :  { %v920_v39 = vadd.f32 %v919_v20, %v2540_v17 }
 0x163   :  { %v1106_v43 = vmax.f32 %v920_v39, 0.0 }
 0x165   :  { %v890_v21 = vpop.f32.mrf.mxu3 }
 0x166   :  { %v891_v18 = vadd.f32 %v890_v21, %v2540_v17 }
 0x167   :  { %v948_v53 = vpop.f32.mrf.mxu1 }
 0x168   :  { %v949_v19 = vadd.f32 %v948_v53, %v2540_v17  ;;  %v1105_v29 = vmax.f32 %v891_v18, 0.0 }
 0x169   :  { %v922_v55 = vpop.f32.mrf.mxu0 }
 0x16a   :  { %v1107_v30 = vmax.f32 %v949_v19, 0.0  ;;  %v923_v36 = vadd.f32 %v922_v55, %v2534_v6 }
 0x16c   :  { %v1114_v41 = vmax.f32 %v923_v36, 0.0 }
 0x16e   :  { %v977_v54 = vpop.f32.mrf.mxu2  ;;  %v893_v56 = vpop.f32.mrf.mxu3 }
 0x16f   :  { %v951_v57 = vpop.f32.mrf.mxu1  ;;  %v894_v4 = vadd.f32 %v893_v56, %v2534_v6  ;;  %v978_v38 = vadd.f32 %v977_v54, %v2540_v17 }
 0x170   :  { %v952_v9 = vadd.f32 %v951_v57, %v2534_v6 }
 0x171   :  { %v925_v60 = vpop.f32.mrf.mxu0  ;;  %v1113_v25 = vmax.f32 %v894_v4, 0.0  ;;  %v1108_v42 = vmax.f32 %v978_v38, 0.0 }
 0x172   :  { %v1115_v26 = vmax.f32 %v952_v9, 0.0  ;;  %v926_v28 = vadd.f32 %v925_v60, %v2530_v63 }
 0x174   :  { %v1122_v37 = vmax.f32 %v926_v28, 0.0 }
 0x176   :  { %v980_v59 = vpop.f32.mrf.mxu2  ;;  %v896_v61 = vpop.f32.mrf.mxu3 }
 0x177   :  { %v954_v62 = vpop.f32.mrf.mxu1  ;;  %v897_v2 = vadd.f32 %v896_v61, %v2530_v63  ;;  %v981_v34 = vadd.f32 %v980_v59, %v2534_v6 }
 0x178   :  { %v955_v0 = vadd.f32 %v954_v62, %v2530_v63 }
 0x179   :  { %v928_v10 = vpop.f32.mrf.mxu0  ;;  %v1121_v13 = vmax.f32 %v897_v2, 0.0  ;;  %v1116_v40 = vmax.f32 %v981_v34, 0.0 }
 0x17a   :  { %v1123_v16 = vmax.f32 %v955_v0, 0.0  ;;  %v929_v22 = vadd.f32 %v928_v10, %v2528_v58 }
 0x17c   :  { %v1130_v32 = vmax.f32 %v929_v22, 0.0 }
 0x17e   :  { %v983_v1 = vpop.f32.mrf.mxu2  ;;  %v899_v3 = vpop.f32.mrf.mxu3 }
 0x17f   :  { %v957_v5 = vpop.f32.mrf.mxu1  ;;  %v900_v7 = vadd.f32 %v899_v3, %v2528_v58  ;;  %v984_v24 = vadd.f32 %v983_v1, %v2530_v63 }
 0x180   :  { %v958_v8 = vadd.f32 %v957_v5, %v2528_v58 }
 0x181   :  { %v1129_v11 = vmax.f32 %v900_v7, 0.0  ;;  %v1124_v35 = vmax.f32 %v984_v24, 0.0 }
 0x182   :  { %v1131_v12 = vmax.f32 %v958_v8, 0.0 }
 0x183   :  { %1159 = vmatpush.msra.mxu3 %v1129_v11 }
 0x184   :  { %1199 = vmatpush.msra.mxu0 %v1131_v12 }
 0x185   :  { %1160 = vmatpush.msra.mxu3 %v1121_v13 }
 0x186   :  { %v986_v23 = vpop.f32.mrf.mxu2  ;;  %1200 = vmatpush.msra.mxu0 %v1123_v16 }
 0x187   :  { %v987_v27 = vadd.f32 %v986_v23, %v2528_v58  ;;  %1161 = vmatpush.msra.mxu3 %v1113_v25 }
 0x188   :  { %1201 = vmatpush.msra.mxu0 %v1115_v26 }
 0x189   :  { %v1132_v31 = vmax.f32 %v987_v27, 0.0  ;;  %1162 = vmatpush.msra.mxu3 %v1105_v29 }
 0x18a   :  { %1202 = vmatpush.msra.mxu0 %v1107_v30  ;;  %1680 = vmatmul.msk.f32.vlgmr.msra.gmra.mxu3 %vm860_vm1, %v2551_v33 }
 0x18b   :  { %1219 = vmatpush.msra.mxu1 %v1132_v31  ;;  %1179 = vmatpush.msrb.mxu3 %v1130_v32 }
 0x18c   :  { %1682 = vmatmul.msk.f32.vlgmr.msra.gmra.mxu0 %vm860_vm1, %v2551_v33 }
 0x18d   :  { %1220 = vmatpush.msra.mxu1 %v1124_v35  ;;  %1180 = vmatpush.msrb.mxu3 %v1122_v37 }
 0x18f   :  { %1221 = vmatpush.msra.mxu1 %v1116_v40  ;;  %1181 = vmatpush.msrb.mxu3 %v1114_v41 }
 0x191   :  { %1222 = vmatpush.msra.mxu1 %v1108_v42  ;;  %1182 = vmatpush.msrb.mxu3 %v1106_v43 }
 0x192   :  { %1683 = vmatmul.msk.f32.vlgmr.msra.gmra.mxu1 %vm860_vm1, %v2551_v33  ;;  %1681 = vmatmul.msk.f32.vlgmr.msrb.gmra.mxu3 %vm860_vm1, %v2551_v33 }
 0x1a0   :  { %v1035_v44 = vpop.f32.mrf.mxu0 }
 0x1a1   :  { %v1036_v1 = vadd.f32 %v1035_v44, %v2540_v17 }
 0x1a2   :  { %v1093_v45 = vpop.f32.mrf.mxu2 }
 0x1a3   :  { %v1094_v3 = vadd.f32 %v1093_v45, %v2540_v17  ;;  %v1110_v13 = vmax.f32 %v1036_v1, 0.0 }
 0x1a5   :  { %v1006_v46 = vpop.f32.mrf.mxu3  ;;  %v1112_v19 = vmax.f32 %v1094_v3, 0.0 }
 0x1a7   :  { %v1064_v47 = vpop.f32.mrf.mxu1 }
 0x1a8   :  { %v1038_v48 = vpop.f32.mrf.mxu0  ;;  %v1065_v24 = vadd.f32 %v1064_v47, %v2540_v17 }
 0x1a9   :  { %v1039_v59 = vadd.f32 %v1038_v48, %v2534_v6 }
 0x1aa   :  { %v1096_v49 = vpop.f32.mrf.mxu2  ;;  %v1111_v28 = vmax.f32 %v1065_v24, 0.0 }
 0x1ab   :  { %v1097_v60 = vadd.f32 %v1096_v49, %v2534_v6  ;;  %v1118_v8 = vmax.f32 %v1039_v59, 0.0 }
 0x1ad   :  { %v1009_v50 = vpop.f32.mrf.mxu3  ;;  %v1120_v4 = vmax.f32 %v1097_v60, 0.0 }
 0x1ae   :  { %v1010_v22 = vadd.f32 %v1009_v50, %v2534_v6 }
 0x1af   :  { %v1067_v51 = vpop.f32.mrf.mxu1 }
 0x1b0   :  { %v1041_v52 = vpop.f32.mrf.mxu0  ;;  %v1068_v23 = vadd.f32 %v1067_v51, %v2534_v6 }
 0x1b1   :  { %v1042_v54 = vadd.f32 %v1041_v52, %v2530_v63 }
 0x1b2   :  { %v1099_v14 = vpop.f32.mrf.mxu2  ;;  %v1119_v27 = vmax.f32 %v1068_v23, 0.0 }
 0x1b3   :  { %v1100_v55 = vadd.f32 %v1099_v14, %v2530_v63  ;;  %v1126_v2 = vmax.f32 %v1042_v54, 0.0 }
 0x1b5   :  { %v1012_v15 = vpop.f32.mrf.mxu3  ;;  %v1128_v0 = vmax.f32 %v1100_v55, 0.0 }
 0x1b6   :  { %v1013_v11 = vadd.f32 %v1012_v15, %v2530_v63 }
 0x1b7   :  { %v1070_v20 = vpop.f32.mrf.mxu1 }
 0x1b8   :  { %v1044_v21 = vpop.f32.mrf.mxu0  ;;  %v1071_v12 = vadd.f32 %v1070_v20, %v2530_v63  ;;  %v1125_v25 = vmax.f32 %v1013_v11, 0.0  ;;  %v1117_v63 = vmax.f32 %v1010_v22, 0.0 }
 0x1b9   :  { %v1045_v56 = vadd.f32 %v1044_v21, %v2528_v58 }
 0x1ba   :  { %v1102_v53 = vpop.f32.mrf.mxu2  ;;  %v1127_v26 = vmax.f32 %v1071_v12, 0.0 }
 0x1bb   :  { %v1103_v57 = vadd.f32 %v1102_v53, %v2528_v58  ;;  %v1134_v61 = vmax.f32 %v1045_v56, 0.0 }
 0x1bd   :  { %v1136_v62 = vmax.f32 %v1103_v57, 0.0  ;;  %1259 = vmatpush.msra.mxu3 %v1134_v61  ;;  %v1015_v5 = vpop.f32.mrf.mxu3 }
 0x1be   :  { %v1016_v9 = vadd.f32 %v1015_v5, %v2528_v58 }
 0x1bf   :  { %1299 = vmatpush.msrb.mxu1 %v1136_v62  ;;  %v1073_v7 = vpop.f32.mrf.mxu1  ;;  %1260 = vmatpush.msra.mxu3 %v1126_v2 }
 0x1c0   :  { %v1074_v10 = vadd.f32 %v1073_v7, %v2528_v58  ;;  %v1133_v16 = vmax.f32 %v1016_v9, 0.0  ;;  %v1007_v58 = vadd.f32 %v1006_v46, %v2540_v17  ;;  %v2589_v17 = vpop.permute.xlu2 %1141 }
 0x1c1   :  { %1300 = vmatpush.msrb.mxu1 %v1128_v0  ;;  %1261 = vmatpush.msra.mxu3 %v1118_v8 }
 0x1c2   :  { %v1135_v18 = vmax.f32 %v1074_v10, 0.0  ;;  %1239 = vmatpush.msra.mxu2 %v1133_v16  ;;  %v1109_v6 = vmax.f32 %v1007_v58, 0.0 }
 0x1c3   :  { %1301 = vmatpush.msrb.mxu1 %v1120_v4  ;;  %1262 = vmatpush.msra.mxu3 %v1110_v13 }
 0x1c4   :  { %1279 = vmatpush.msrb.mxu0 %v1135_v18  ;;  %1685 = vmatmul.msk.f32.vlgmr.msra.gmra.mxu3 %vm860_vm1, %v2551_v33 }
 0x1c5   :  { %1302 = vmatpush.msrb.mxu1 %v1112_v19  ;;  %1240 = vmatpush.msra.mxu2 %v1125_v25 }
 0x1c6   :  { %1687 = vmatmul.msk.f32.vlgmr.msrb.gmra.mxu1 %vm860_vm1, %v2551_v33  ;;  %1280 = vmatpush.msrb.mxu0 %v1127_v26 }
 0x1c7   :  { %1241 = vmatpush.msra.mxu2 %v1117_v63 }
 0x1c8   :  { %1281 = vmatpush.msrb.mxu0 %v1119_v27 }
 0x1c9   :  { %1242 = vmatpush.msra.mxu2 %v1109_v6 }
 0x1ca   :  { %1282 = vmatpush.msrb.mxu0 %v1111_v28  ;;  %1684 = vmatmul.msk.f32.vlgmr.msra.gmra.mxu2 %vm860_vm1, %v2551_v33 }
 0x1cb   :  { %1686 = vmatmul.msk.f32.vlgmr.msrb.gmra.mxu0 %vm860_vm1, %v2551_v33 }
 0x209   :  { %v1204_v29 = vpop.f32.mrf.mxu0 }
 0x20a   :  { %v1205_v30 = vadd.f32 %v1204_v29, %v2589_v17 }
 0x20c   :  { %v1352_v31 = vmin.f32 %v1205_v30, 20.0  ;;  %v1316_v48 = vrot.slane %v1205_v30, 6  ;;  %vm1344_vm6 = vcmp.gt.f32.partialorder %v1205_v30, 20.0 }
 0x20d   :  { %v1164_v34 = vpop.f32.mrf.mxu3 }
 0x20e   :  { %v1362_v32 = vmul.f32 1.442695, %v1352_v31  ;;  %v2593_v35 = vadd.f32 %v1164_v34, %v2589_v17 }
 0x20f   :  { %v1224_v36 = vpop.f32.mrf.mxu1 }
 0x210   :  { %1693 = vpow2.f32 %v1362_v32  ;;  %v2596_v37 = vadd.f32 %v1224_v36, %v2589_v17  ;;  %v1350_v38 = vmin.f32 %v2593_v35, 20.0  ;;  %vm1342_vm8 = vcmp.gt.f32.partialorder %v2593_v35, 20.0 }
 0x212   :  { %v1353_v33 = vmin.f32 %v2596_v37, 20.0  ;;  %v1358_v39 = vmul.f32 1.442695, %v1350_v38  ;;  %v1317_v46 = vrot.slane %v2596_v37, 5  ;;  %vm1345_vm10 = vcmp.gt.f32.partialorder %v2596_v37, 20.0 }
 0x214   :  { %v1364_v40 = vmul.f32 1.442695, %v1353_v33  ;;  %1695 = vpow2.f32 %v1358_v39  ;;  %v1325_v21 = vsel %vm1324_vm3, %v1316_v48, %v1317_v46 }
 0x215   :  { %v1184_v42 = vpop.f32.mrf.mxu3 }
 0x216   :  { %v1694_v41 = vpop.eup %1693  ;;  %1697 = vpow2.f32 %v1364_v40  ;;  %v2601_v44 = vadd.f32 %v1184_v42, %v2589_v17 }
 0x217   :  { %v1392_v43 = vadd.f32 1.0, %v1694_v41  ;;  %v1395_v45 = vmul.f32 -0.5, %v1694_v41  ;;  %v1398_v53 = vand.u32 2147483647, %v1694_v41 }
 0x218   :  { %v1315_v47 = vrot.slane %v2601_v44, 7  ;;  %v1351_v49 = vmin.f32 %v2601_v44, 20.0  ;;  %vm1343_vm12 = vcmp.gt.f32.partialorder %v2601_v44, 20.0 }
 0x219   :  { %1699 = vlog2.f32 %v1392_v43  ;;  %v1396_v14 = vadd.f32 1.0, %v1395_v45  ;;  %vm1399_vm5 = vcmp.lt.f32.partialorder %v1398_v53, 0.0004427343 }
 0x21a   :  { %v1696_v50 = vpop.eup %1695  ;;  %v1323_v51 = vsel %vm1322_vm2, %v2593_v35, %v1315_v47  ;;  %v1360_v20 = vmul.f32 1.442695, %v1351_v49 }
 0x21b   :  { %v1374_v15 = vadd.f32 1.0, %v1696_v50  ;;  %v1377_v54 = vmul.f32 -0.5, %v1696_v50  ;;  %v2607_v56 = vsel %vm1326_vm4, %v1323_v51, %v1325_v21  ;;  %v1397_v61 = vmul.f32 %v1694_v41, %v1396_v14 }
 0x21c   :  { %v1698_v52 = vpop.eup %1697  ;;  %v1380_v2 = vand.u32 2147483647, %v1696_v50 }
 0x21d   :  { %v1401_v55 = vadd.f32 1.0, %v1698_v52  ;;  %1701 = vlog2.f32 %v1374_v15  ;;  %v1404_v57 = vmul.f32 -0.5, %v1698_v52  ;;  %v1378_v62 = vadd.f32 1.0, %v1377_v54 }
 0x21e   :  { %v1407_v5 = vand.u32 2147483647, %v1698_v52  ;;  %vm1381_vm7 = vcmp.lt.f32.partialorder %v1380_v2, 0.0004427343 }
 0x21f   :  { %v1700_v59 = vpop.eup %1699  ;;  %1703 = vlog2.f32 %v1401_v55  ;;  %v1405_v0 = vadd.f32 1.0, %v1404_v57  ;;  %v1379_v9 = vmul.f32 %v1696_v50, %v1378_v62 }
 0x220   :  { %v1394_v60 = vmul.f32 0.6931472, %v1700_v59  ;;  %1705 = vpow2.f32 %v1360_v20  ;;  %vm1408_vm9 = vcmp.lt.f32.partialorder %v1407_v5, 0.0004427343 }
 0x221   :  { %v1406_v12 = vmul.f32 %v1698_v52, %v1405_v0 }
 0x222   :  { %v1400_v1 = vsel %vm1399_vm5, %v1397_v61, %v1394_v60 }
 0x223   :  { %v1448_v3 = vsel %vm1344_vm6, %v1205_v30, %v1400_v1  ;;  %v1702_v7 = vpop.eup %1701 }
 0x224   :  { %1464 = vst [vmem:[#allocation1 + $0x12] sm:$0xff] %v1448_v3  ;;  %v1376_v4 = vmul.f32 0.6931472, %v1702_v7 }
 0x225   :  { %v1704_v8 = vpop.eup %1703 }
 0x226   :  { %v1706_v10 = vpop.eup %1705  ;;  %v1403_v11 = vmul.f32 0.6931472, %v1704_v8  ;;  %v1382_v13 = vsel %vm1381_vm7, %v1379_v9, %v1376_v4 }
 0x227   :  { %v1383_v16 = vadd.f32 1.0, %v1706_v10  ;;  %v1446_v18 = vsel %vm1342_vm8, %v2593_v35, %v1382_v13  ;;  %v1386_v22 = vmul.f32 -0.5, %v1706_v10  ;;  %v1389_v24 = vand.u32 2147483647, %v1706_v10 }
 0x228   :  { %v1409_v19 = vsel %vm1408_vm9, %v1406_v12, %v1403_v11  ;;  %1462 = vst [vmem:[#allocation1] sm:$0xff] %v1446_v18 }
 0x229   :  { %v1449_v23 = vsel %vm1345_vm10, %v2596_v37, %v1409_v19  ;;  %1707 = vlog2.f32 %v1383_v16  ;;  %v1387_v58 = vadd.f32 1.0, %v1386_v22  ;;  %vm1390_vm11 = vcmp.lt.f32.partialorder %v1389_v24, 0.0004427343 }
 0x22a   :  { %1465 = vst [vmem:[#allocation1 + $0x1b] sm:$0xff] %v1449_v23 }
 0x22b   :  { %v1388_v63 = vmul.f32 %v1706_v10, %v1387_v58 }
 0x22f   :  { %v1708_v25 = vpop.eup %1707 }
 0x230   :  { %v1385_v26 = vmul.f32 0.6931472, %v1708_v25 }
 0x232   :  { %v1391_v27 = vsel %vm1390_vm11, %v1388_v63, %v1385_v26 }
 0x233   :  { %v1447_v6 = vsel %vm1343_vm12, %v2601_v44, %v1391_v27  ;;  %v1337_v44 = vlaneseq }
 0x234   :  { %1463 = vst [vmem:[#allocation1 + $0x9] sm:$0xff] %v1447_v6 }
 0x235   :  { %vm2633_vm1 = vcmp.lt.s32.totalorder %v1337_v44, 1000 }
 0x243   :  { %v1304_v28 = vpop.f32.mrf.mxu1 }
 0x244   :  { %v1305_v29 = vadd.f32 %v1304_v28, %v2589_v17 }
 0x246   :  { %v1357_v30 = vmin.f32 %v1305_v29, 20.0  ;;  %v1321_v45 = vrot.slane %v1305_v29, 1  ;;  %vm1349_vm3 = vcmp.gt.f32.partialorder %v1305_v29, 20.0 }
 0x247   :  { %v1264_v32 = vpop.f32.mrf.mxu3 }
 0x248   :  { %v1372_v31 = vmul.f32 1.442695, %v1357_v30  ;;  %v1284_v34 = vpop.f32.mrf.mxu0  ;;  %v2617_v35 = vadd.f32 %v1264_v32, %v2589_v17 }
 0x249   :  { %v2620_v36 = vadd.f32 %v1284_v34, %v2589_v17 }
 0x24a   :  { %1709 = vpow2.f32 %v1372_v31  ;;  %v1355_v37 = vmin.f32 %v2617_v35, 20.0  ;;  %v1319_v48 = vrot.slane %v2617_v35, 3  ;;  %vm1347_vm5 = vcmp.gt.f32.partialorder %v2617_v35, 20.0 }
 0x24b   :  { %v1356_v38 = vmin.f32 %v2620_v36, 20.0  ;;  %v1320_v42 = vrot.slane %v2620_v36, 2  ;;  %vm1348_vm7 = vcmp.gt.f32.partialorder %v2620_v36, 20.0 }
 0x24c   :  { %v1368_v33 = vmul.f32 1.442695, %v1355_v37 }
 0x24d   :  { %v1370_v39 = vmul.f32 1.442695, %v1356_v38  ;;  %v1244_v40 = vpop.f32.mrf.mxu2 }
 0x24e   :  { %1711 = vpow2.f32 %v1368_v33  ;;  %v2626_v43 = vadd.f32 %v1244_v40, %v2589_v17  ;;  %v1331_v17 = vsel %vm1330_vm14, %v1320_v42, %v1321_v45 }
 0x24f   :  { %1713 = vpow2.f32 %v1370_v39 }
 0x250   :  { %v1710_v41 = vpop.eup %1709  ;;  %v1318_v49 = vrot.slane %v2626_v43, 4  ;;  %v1354_v50 = vmin.f32 %v2626_v43, 20.0  ;;  %vm1346_vm9 = vcmp.gt.f32.partialorder %v2626_v43, 20.0 }
 0x251   :  { %v1437_v46 = vadd.f32 1.0, %v1710_v41  ;;  %v1440_v47 = vmul.f32 -0.5, %v1710_v41  ;;  %v1443_v55 = vand.u32 2147483647, %v1710_v41 }
 0x252   :  { %v1366_v51 = vmul.f32 1.442695, %v1354_v50  ;;  %v1329_v52 = vsel %vm1328_vm13, %v1318_v49, %v1319_v48 }
 0x253   :  { %1715 = vlog2.f32 %v1437_v46  ;;  %v1333_v15 = vsel %vm1332_vm15, %v1329_v52, %v1331_v17  ;;  %v1441_v21 = vadd.f32 1.0, %v1440_v47  ;;  %vm1444_vm2 = vcmp.lt.f32.partialorder %v1443_v55, 0.0004427343 }
 0x254   :  { %v1712_v20 = vpop.eup %1711  ;;  %1717 = vpow2.f32 %v1366_v51  ;;  %v1335_v53 = vsel %vm1334_vm0, %v2607_v56, %v1333_v15 }
 0x255   :  { %v1714_v54 = vpop.eup %1713  ;;  %v1419_v57 = vadd.f32 1.0, %v1712_v20  ;;  %1341 = vst.msk [vmem:[#allocation2] ss:$2 sm:$0xff] %vm2633_vm1, %v1335_v53  ;;  %v1422_v59 = vmul.f32 -0.5, %v1712_v20  ;;  %v1442_v2 = vmul.f32 %v1710_v41, %v1441_v21  ;;  %v1425_v7 = vand.u32 2147483647, %v1712_v20 }
 0x256   :  { %v1428_v60 = vadd.f32 1.0, %v1714_v54  ;;  %v1431_v62 = vmul.f32 -0.5, %v1714_v54  ;;  %v1434_v9 = vand.u32 2147483647, %v1714_v54 }
 0x257   :  { %1719 = vlog2.f32 %v1419_v57  ;;  %v1423_v5 = vadd.f32 1.0, %v1422_v59  ;;  %vm1426_vm4 = vcmp.lt.f32.partialorder %v1425_v7, 0.0004427343 }
 0x258   :  { %1721 = vlog2.f32 %v1428_v60  ;;  %v1432_v8 = vadd.f32 1.0, %v1431_v62  ;;  %vm1435_vm6 = vcmp.lt.f32.partialorder %v1434_v9, 0.0004427343 }
 0x259   :  { %v1716_v61 = vpop.eup %1715  ;;  %v1424_v16 = vmul.f32 %v1712_v20, %v1423_v5 }
 0x25a   :  { %v1439_v1 = vmul.f32 0.6931472, %v1716_v61  ;;  %v1718_v0 = vpop.eup %1717  ;;  %v1433_v19 = vmul.f32 %v1714_v54, %v1432_v8 }
 0x25b   :  { %v1410_v4 = vadd.f32 1.0, %v1718_v0  ;;  %v1413_v10 = vmul.f32 -0.5, %v1718_v0  ;;  %v1416_v25 = vand.u32 2147483647, %v1718_v0 }
 0x25c   :  { %v1445_v3 = vsel %vm1444_vm2, %v1442_v2, %v1439_v1 }
 0x25d   :  { %v1453_v56 = vsel %vm1349_vm3, %v1305_v29, %v1445_v3  ;;  %v1720_v11 = vpop.eup %1719  ;;  %1723 = vlog2.f32 %v1410_v4  ;;  %v1414_v23 = vadd.f32 1.0, %v1413_v10  ;;  %vm1417_vm8 = vcmp.lt.f32.partialorder %v1416_v25, 0.0004427343 }
 0x25e   :  { %1469 = vst [vmem:[#allocation1 + $0x3f] sm:$0xff] %v1453_v56  ;;  %v1722_v12 = vpop.eup %1721  ;;  %v1421_v13 = vmul.f32 0.6931472, %v1720_v11 }
 0x25f   :  { %v1430_v18 = vmul.f32 0.6931472, %v1722_v12  ;;  %v1415_v6 = vmul.f32 %v1718_v0, %v1414_v23 }
 0x260   :  { %v1427_v22 = vsel %vm1426_vm4, %v1424_v16, %v1421_v13 }
 0x261   :  { %v1451_v58 = vsel %vm1347_vm5, %v2617_v35, %v1427_v22  ;;  %v1436_v24 = vsel %vm1435_vm6, %v1433_v19, %v1430_v18 }
 0x262   :  { %1467 = vst [vmem:[#allocation1 + $0x2d] sm:$0xff] %v1451_v58  ;;  %v1452_v26 = vsel %vm1348_vm7, %v2620_v36, %v1436_v24 }
 0x263   :  { %v1724_v63 = vpop.eup %1723  ;;  %1468 = vst [vmem:[#allocation1 + $0x36] sm:$0xff] %v1452_v26 }
 0x264   :  { %v1412_v27 = vmul.f32 0.6931472, %v1724_v63 }
 0x266   :  { %v1418_v28 = vsel %vm1417_vm8, %v1415_v6, %v1412_v27 }
 0x267   :  { %v1450_v29 = vsel %vm1346_vm9, %v2626_v43, %v1418_v28 }
 0x268   :  { %1466 = vst [vmem:[#allocation1 + $0x24] sm:$0xff] %v1450_v29 }
 0x26f   :  { %v1471_v30 = vld [vmem:[#allocation1 + $0x1] ss:$9 sm:$0xff] }
 0x270   :  { %1474 = vst.msk [vmem:[#allocation2 + $0x1] ss:$2 sm:$0xff] %vm2633_vm1, %v1471_v30 }
 0x271   :  { %1485 = dma.vmem_to_hbm [thread:$0]  %s1481_s21, 256, %s1483_s24, [#allocation3]  }
 0x272   :  { %1749 = dma.done.wait [#allocation3], 256  }
 0x273   :  { %1750 = vsyncadd [#allocation3], 4294967040 }
 0x274   :  { %1490 = vsyncpa [#allocation3], 1 }

</bundles_post_ra>
